<compile_context>
chip_gen: v7x
topology: tpu7x:2x2x1
jax: 0.10.0
libtpu: 0.0.40
codegen_flags: <defaults>
</compile_context>

<pallas_src>
import functools
import math

import jax
import jax.numpy as jnp
from jax.experimental import pallas as pl
from jax.experimental.pallas import tpu as pltpu


_LANE = 128      # feature dims padded to multiples of the 128-wide lane axis
_SUBLANE = 8     # f32 sublane granularity on the batch axis
_ACTIVATIONS = ("relu", "selu", "tanh", "gelu")


def _round_up(x, m):
    return (x + m - 1) // m * m


# ----------------------------------------------------------------------------
# activation helpers (traced inside the fused Pallas kernel)
# ----------------------------------------------------------------------------
def _apply_activation(y, activation):
    if activation is None:
        return y
    if activation == "relu":
        return jnp.maximum(y, 0.0)
    if activation == "tanh":
        return jnp.tanh(y)
    if activation == "selu":
        alpha = 1.6732632423543772848170429916717
        scale = 1.0507009873554804934193349852946
        return scale * jnp.where(y > 0, y, alpha * (jnp.exp(y) - 1.0))
    if activation == "gelu":
        # PyTorch nn.GELU() default = exact erf formulation
        return 0.5 * y * (1.0 + jax.lax.erf(y * (1.0 / math.sqrt(2.0))))
    raise NotImplementedError(activation)


# ----------------------------------------------------------------------------
# single fused kernel for the whole op stack
# ----------------------------------------------------------------------------
def _fused_mlp_kernel(*refs, plan):
    """refs = (x_ref, w0, b0, w1, b1, ..., o_ref).

    `plan` is a static tuple of ops:
      ("linear", act_or_None) -> consumes the next (w, b) ref pair, fused act
      ("act",    name)        -> standalone elementwise activation
      ("scale",  s)           -> elementwise scale (unfolded batchnorm)
    All intermediates stay in registers/VMEM; only the final lane-dense
    (tile_b, out_pad) block is stored.
    """
    x_ref = refs[0]
    o_ref = refs[-1]
    wb_refs = refs[1:-1]

    y = x_ref[...].astype(jnp.float32)
    wi = 0
    for kind, payload in plan:
        if kind == "linear":
            w = wb_refs[wi][...]
            b = wb_refs[wi + 1][...]
            wi += 2
            y = jnp.dot(y, w, preferred_element_type=jnp.float32) + b
            y = _apply_activation(y, payload)
        elif kind == "act":
            y = _apply_activation(y, payload)
        elif kind == "scale":
            y = y * payload
        else:
            raise NotImplementedError(kind)
    o_ref[...] = y.astype(o_ref.dtype)


def fused_mlp(x, weights, plan, out_dim_padded, *, tile_b=512):
    """x: (B, in_pad) already lane-padded.  Returns (B, out_dim_padded)."""
    B, in_pad = x.shape
    B_pad = _round_up(max(B, 1), _SUBLANE)
    tile_b = min(tile_b, B_pad)
    while B_pad % tile_b:           # make the batch tile divide the padded batch
        tile_b -= _SUBLANE
    if B_pad != B:
        x = jnp.pad(x, ((0, B_pad - B), (0, 0)))
    grid = (B_pad // tile_b,)

    in_specs = [pl.BlockSpec((tile_b, in_pad), lambda i: (i, 0))]
    flat_wb = []
    for w, b in weights:
        in_specs.append(pl.BlockSpec(w.shape, lambda i: (0, 0)))  # full weight block
        in_specs.append(pl.BlockSpec(b.shape, lambda i: (0, 0)))  # full bias block
        flat_wb += [w, b]

    kernel = functools.partial(_fused_mlp_kernel, plan=tuple(plan))
    out = pl.pallas_call(
        kernel,
        out_shape=jax.ShapeDtypeStruct((B_pad, out_dim_padded), x.dtype),
        grid=grid,
        in_specs=in_specs,
        out_specs=pl.BlockSpec((tile_b, out_dim_padded), lambda i: (i, 0)),
        compiler_params=pltpu.CompilerParams(
            dimension_semantics=("parallel",)),  # shard batch over TCs on v7x
    )(x, *flat_wb)
    return out[:B]


# ----------------------------------------------------------------------------
# NeuralNetwork (inference-mode semantics)
# ----------------------------------------------------------------------------
class NeuralNetworkPallas:
    """Mirrors karolos NeuralNetwork: cat(args, -1) -> Flatten -> op stack."""

    def __init__(self, in_dim, network_structure, key):
        assert isinstance(in_dim, int)
        self.in_dim = in_dim
        self.in_dim_pad = _round_up(in_dim, _LANE)
        self.weights = []       # padded (W(in_pad,out_pad), b(1,out_pad))
        self._ref_weights = []  # unpadded, for the pure-JAX reference check
        plan = []
        cur, cur_pad = in_dim, self.in_dim_pad
        pending_scale = None

        for layer, params in network_structure:
            if layer == "linear":
                key, kw, kb = jax.random.split(key, 3)
                bound = 1.0 / math.sqrt(cur)  # nn.Linear default init range
                w = jax.random.uniform(kw, (cur, params), jnp.float32, -bound, bound)
                b = jax.random.uniform(kb, (1, params), jnp.float32, -bound, bound)
                self._ref_weights.append((w, b, pending_scale))
                if pending_scale is not None:
                    w = w * pending_scale      # fold batchnorm scale: (s*x)@W == x@(s*W)
                    pending_scale = None
                out_pad = _round_up(params, _LANE)
                w_pad = jnp.zeros((cur_pad, out_pad), jnp.float32).at[:cur, :params].set(w)
                b_pad = jnp.zeros((1, out_pad), jnp.float32).at[:, :params].set(b)
                self.weights.append((w_pad, b_pad))
                plan.append(("linear", None))
                cur, cur_pad = params, out_pad
            elif layer in _ACTIVATIONS:
                assert params is None
                if pending_scale is not None:
                    plan.append(("scale", pending_scale))
                    pending_scale = None
                if plan and plan[-1][0] == "linear" and plan[-1][1] is None:
                    plan[-1] = ("linear", layer)   # fuse act into previous linear
                else:
                    plan.append(("act", layer))
            elif layer == "dropout":
                # TODO(synk): training-mode dropout (random mask); eval mode is identity.
                pass
            elif layer == "batchnorm":
                # TODO(synk): eval-mode BatchNorm1d with fresh running stats
                # (mean=0, var=1, affine identity) == constant scale; training-mode
                # batch statistics are not implemented.
                s = 1.0 / math.sqrt(1.0 + 1e-5)
                pending_scale = s if pending_scale is None else pending_scale * s
            else:
                raise NotImplementedError(f"{layer} not known")

        if pending_scale is not None:
            plan.append(("scale", pending_scale))
        self.plan = tuple(plan)
        self.out_dim = cur
        self.out_dim_pad = cur_pad

    def __call__(self, *args):
        x = jnp.concatenate(args, axis=-1)
        x = x.reshape(x.shape[0], -1)  # Flatten
        assert x.shape[1] == self.in_dim
        if self.in_dim_pad != self.in_dim:
            x = jnp.pad(x, ((0, 0), (0, self.in_dim_pad - self.in_dim)))
        y = fused_mlp(x, self.weights, self.plan, self.out_dim_pad)
        return y[:, : self.out_dim]

    # pure-JAX reference (no Pallas), for numerical verification
    def reference(self, *args):
        x = jnp.concatenate(args, axis=-1)
        x = x.reshape(x.shape[0], -1)
        wi = 0
        for kind, payload in self.plan:
            if kind == "linear":
                w, b, pre_scale = self._ref_weights[wi]
                wi += 1
                if pre_scale is not None:
                    x = x * pre_scale
                x = x @ w + b
                x = _apply_activation(x, payload)
            elif kind == "act":
                x = _apply_activation(x, payload)
            elif kind == "scale":
                x = x * payload
        return x


# ----------------------------------------------------------------------------
# main
# ----------------------------------------------------------------------------
if __name__ == "__main__":
    key = jax.random.PRNGKey(0)
    key, k_a, k_b, k_net = jax.random.split(key, 4)

    batch = 2
    # two input tensors concatenated along the last dim -> in_dim = 16
    a = jax.random.normal(k_a, (batch, 8), jnp.float32)
    b = jax.random.normal(k_b, (batch, 8), jnp.float32)
    in_dim = 16

    network_structure = [
        ("linear", 32),
        ("relu", None),
        ("linear", 32),
        ("selu", None),
        ("dropout", 0.1),
        ("batchnorm", None),
        ("linear", 8),
        ("tanh", None),
    ]

    net = NeuralNetworkPallas(in_dim, network_structure, k_net)
    out = net(a, b)
    out = jax.block_until_ready(out)

    assert out.shape == (batch, 8)
    assert bool(jnp.all(jnp.isfinite(out)))

    ref = net.reference(a, b)
    assert bool(jnp.allclose(out, ref, rtol=2e-4, atol=2e-4))

    print("KERNEL_OK")
</pallas_src>

<mosaic_0001>
module attributes {stable_mosaic.version = 11 : i64} {
  func.func @_fused_mlp_kernel(%arg0: i32, %arg1: memref<8x128xf32, #tpu.memory_space<vmem>>, %arg2: memref<128x128xf32, #tpu.memory_space<vmem>>, %arg3: memref<1x128xf32, #tpu.memory_space<vmem>>, %arg4: memref<128x128xf32, #tpu.memory_space<vmem>>, %arg5: memref<1x128xf32, #tpu.memory_space<vmem>>, %arg6: memref<128x128xf32, #tpu.memory_space<vmem>>, %arg7: memref<1x128xf32, #tpu.memory_space<vmem>>, %arg8: memref<8x128xf32, #tpu.memory_space<vmem>>) attributes {dimension_semantics = [#tpu.dimension_semantics<parallel>], iteration_bounds = array<i64: 1>, scalar_prefetch = 0 : i64, scratch_operands = 0 : i64, tpu.core_type = #tpu.core_type<tc>, window_params = [{transform_indices = @transform_0, window_bounds = array<i64: 8, 128>}, {pipeline_mode = #tpu.pipeline_mode<synchronous>, transform_indices = @transform_1, window_bounds = array<i64: 128, 128>}, {pipeline_mode = #tpu.pipeline_mode<synchronous>, transform_indices = @transform_2, window_bounds = array<i64: 1, 128>}, {pipeline_mode = #tpu.pipeline_mode<synchronous>, transform_indices = @transform_3, window_bounds = array<i64: 128, 128>}, {pipeline_mode = #tpu.pipeline_mode<synchronous>, transform_indices = @transform_4, window_bounds = array<i64: 1, 128>}, {pipeline_mode = #tpu.pipeline_mode<synchronous>, transform_indices = @transform_5, window_bounds = array<i64: 128, 128>}, {pipeline_mode = #tpu.pipeline_mode<synchronous>, transform_indices = @transform_6, window_bounds = array<i64: 1, 128>}, {transform_indices = @transform_7, window_bounds = array<i64: 8, 128>}]} {
    %c0 = arith.constant 0 : index
    %c0_0 = arith.constant 0 : index
    %0 = vector.load %arg1[%c0, %c0_0] : memref<8x128xf32, #tpu.memory_space<vmem>>, vector<8x128xf32>
    %c0_1 = arith.constant 0 : index
    %c0_2 = arith.constant 0 : index
    %1 = vector.load %arg2[%c0_1, %c0_2] : memref<128x128xf32, #tpu.memory_space<vmem>>, vector<128x128xf32>
    %c0_3 = arith.constant 0 : index
    %c0_4 = arith.constant 0 : index
    %2 = vector.load %arg3[%c0_3, %c0_4] : memref<1x128xf32, #tpu.memory_space<vmem>>, vector<1x128xf32>
    %cst = arith.constant dense<0.000000e+00> : vector<8x128xf32>
    %3 = tpu.matmul %0, %1, %cst {dimension_numbers = #tpu.dot_dimension_numbers<[1], [0], [0], [1], [0, 0, 1, 1], [], []>} : vector<8x128xf32>, vector<128x128xf32>, vector<8x128xf32> -> vector<8x128xf32>
    %4 = vector.broadcast %2 : vector<1x128xf32> to vector<8x128xf32>
    %5 = arith.addf %3, %4 : vector<8x128xf32>
    %cst_5 = arith.constant 0.000000e+00 : f32
    %6 = vector.broadcast %cst_5 : f32 to vector<8x128xf32>
    %7 = arith.maximumf %5, %6 : vector<8x128xf32>
    %c0_6 = arith.constant 0 : index
    %c0_7 = arith.constant 0 : index
    %8 = vector.load %arg4[%c0_6, %c0_7] : memref<128x128xf32, #tpu.memory_space<vmem>>, vector<128x128xf32>
    %c0_8 = arith.constant 0 : index
    %c0_9 = arith.constant 0 : index
    %9 = vector.load %arg5[%c0_8, %c0_9] : memref<1x128xf32, #tpu.memory_space<vmem>>, vector<1x128xf32>
    %cst_10 = arith.constant dense<0.000000e+00> : vector<8x128xf32>
    %10 = tpu.matmul %7, %8, %cst_10 {dimension_numbers = #tpu.dot_dimension_numbers<[1], [0], [0], [1], [0, 0, 1, 1], [], []>} : vector<8x128xf32>, vector<128x128xf32>, vector<8x128xf32> -> vector<8x128xf32>
    %11 = vector.broadcast %9 : vector<1x128xf32> to vector<8x128xf32>
    %12 = arith.addf %10, %11 : vector<8x128xf32>
    %cst_11 = arith.constant 0.000000e+00 : f32
    %13 = vector.broadcast %cst_11 : f32 to vector<8x128xf32>
    %14 = arith.cmpf ogt, %12, %13 : vector<8x128xf32>
    %15 = math.exp %12 : vector<8x128xf32>
    %cst_12 = arith.constant 1.000000e+00 : f32
    %16 = vector.broadcast %cst_12 : f32 to vector<8x128xf32>
    %17 = arith.subf %15, %16 : vector<8x128xf32>
    %cst_13 = arith.constant 1.67326319 : f32
    %18 = vector.broadcast %cst_13 : f32 to vector<8x128xf32>
    %19 = arith.mulf %18, %17 : vector<8x128xf32>
    %20 = arith.select %14, %12, %19 : vector<8x128xi1>, vector<8x128xf32>
    %cst_14 = arith.constant 1.05070102 : f32
    %21 = vector.broadcast %cst_14 : f32 to vector<8x128xf32>
    %22 = arith.mulf %21, %20 : vector<8x128xf32>
    %c0_15 = arith.constant 0 : index
    %c0_16 = arith.constant 0 : index
    %23 = vector.load %arg6[%c0_15, %c0_16] : memref<128x128xf32, #tpu.memory_space<vmem>>, vector<128x128xf32>
    %c0_17 = arith.constant 0 : index
    %c0_18 = arith.constant 0 : index
    %24 = vector.load %arg7[%c0_17, %c0_18] : memref<1x128xf32, #tpu.memory_space<vmem>>, vector<1x128xf32>
    %cst_19 = arith.constant dense<0.000000e+00> : vector<8x128xf32>
    %25 = tpu.matmul %22, %23, %cst_19 {dimension_numbers = #tpu.dot_dimension_numbers<[1], [0], [0], [1], [0, 0, 1, 1], [], []>} : vector<8x128xf32>, vector<128x128xf32>, vector<8x128xf32> -> vector<8x128xf32>
    %26 = vector.broadcast %24 : vector<1x128xf32> to vector<8x128xf32>
    %27 = arith.addf %25, %26 : vector<8x128xf32>
    %28 = math.tanh %27 : vector<8x128xf32>
    %c0_20 = arith.constant 0 : index
    %c0_21 = arith.constant 0 : index
    %29 = vector.load %arg8[%c0_20, %c0_21] : memref<8x128xf32, #tpu.memory_space<vmem>>, vector<8x128xf32>
    tpu.vector_store %arg8[%c0_20, %c0_21], %28 {strides = array<i32>} : memref<8x128xf32, #tpu.memory_space<vmem>>, vector<8x128xf32>,
    return
  }
  func.func @transform_0(%arg0: i32) -> (i32, i32) {
    %c0_i32 = arith.constant 0 : i32
    %c0_i32_0 = arith.constant 0 : i32
    return %arg0, %c0_i32 : i32, i32
  }
  func.func @transform_1(%arg0: i32) -> (i32, i32) {
    %c0_i32 = arith.constant 0 : i32
    %c0_i32_0 = arith.constant 0 : i32
    %c0_i32_1 = arith.constant 0 : i32
    return %c0_i32, %c0_i32_0 : i32, i32
  }
  func.func @transform_2(%arg0: i32) -> (i32, i32) {
    %c0_i32 = arith.constant 0 : i32
    %c0_i32_0 = arith.constant 0 : i32
    %c0_i32_1 = arith.constant 0 : i32
    return %c0_i32, %c0_i32_0 : i32, i32
  }
  func.func @transform_3(%arg0: i32) -> (i32, i32) {
    %c0_i32 = arith.constant 0 : i32
    %c0_i32_0 = arith.constant 0 : i32
    %c0_i32_1 = arith.constant 0 : i32
    return %c0_i32, %c0_i32_0 : i32, i32
  }
  func.func @transform_4(%arg0: i32) -> (i32, i32) {
    %c0_i32 = arith.constant 0 : i32
    %c0_i32_0 = arith.constant 0 : i32
    %c0_i32_1 = arith.constant 0 : i32
    return %c0_i32, %c0_i32_0 : i32, i32
  }
  func.func @transform_5(%arg0: i32) -> (i32, i32) {
    %c0_i32 = arith.constant 0 : i32
    %c0_i32_0 = arith.constant 0 : i32
    %c0_i32_1 = arith.constant 0 : i32
    return %c0_i32, %c0_i32_0 : i32, i32
  }
  func.func @transform_6(%arg0: i32) -> (i32, i32) {
    %c0_i32 = arith.constant 0 : i32
    %c0_i32_0 = arith.constant 0 : i32
    %c0_i32_1 = arith.constant 0 : i32
    return %c0_i32, %c0_i32_0 : i32, i32
  }
  func.func @transform_7(%arg0: i32) -> (i32, i32) {
    %c0_i32 = arith.constant 0 : i32
    %c0_i32_0 = arith.constant 0 : i32
    return %arg0, %c0_i32 : i32, i32
  }
}

</mosaic_0001>

<bundles_post_ra>
// kernel: tpu_custom_call.1
= control target key start
LH: loop header
LB: loop body
LE: loop exit
PB: predicated region body
PF: predicated region fallthrough
CT: control target
= control target key end

     0   :  { %12 = vsyncpa [#allocation3], 0  ;;  %s909_s0 = inlined_call_operand.hbm [shape: f32[8,128], index: 0, kind: input, shape index: {}]   ;;  %s910_s1 = inlined_call_operand.hbm [shape: f32[128,128], index: 1, kind: input, shape index: {}]   ;;  %s911_s2 = inlined_call_operand.vmem [shape: f32[1,128], index: 2, kind: input, shape index: {}]   ;;  %s912_s3 = inlined_call_operand.hbm [shape: f32[128,128], index: 3, kind: input, shape index: {}]   ;;  %s913_s4 = inlined_call_operand.vmem [shape: f32[1,128], index: 4, kind: input, shape index: {}]   ;;  %s914_s5 = inlined_call_operand.hbm [shape: f32[128,128], index: 5, kind: input, shape index: {}]   ;;  %s915_s6 = inlined_call_operand.vmem [shape: f32[1,128], index: 6, kind: input, shape index: {}]   ;;  %s916_s7 = inlined_call_operand.hbm [shape: f32[8,128], index: 7, kind: output, shape index: {}]  }
   0x1   :  { %13 = vsyncpa [#allocation6], 0 }
   0x2   :  { %14 = vsyncpa [#allocation9], 0 }
   0x3   :  { %15 = vsyncpa [#allocation4], 0  ;;  %s751_s24 = smov [#allocation5]   ;;  %s633_s28 = scalar_lea.hbm %s910_s1, 2048 }
   0x4   :  { %s31_s25 = sshll.u32 %s751_s24, 4  ;;  %p634_p0 = scmp.ne.s32.totalorder %s910_s1, %s633_s28  ;;  %s32_s25 = int_to_ptr.vmem [resolvable:$true] %s31_s25 }
   0x5   :  { %p637_p1 = scmp.lt.u32.totalorder %s633_s28, %s910_s1 }
   0x7   :  { %p639_p2 = pnand %p637_p1, %p634_p0 }
   0x9   :  { %642 = shalt.err (!%p639_p2)
}
   0xa   :  { %s643_s10 = scalar_lea.vmem %s32_s25, 2048  ;;  %p648_p4 = scmp.lt.s32.totalorder %s32_s25, %s32_s25 }
   0xb   :  { %p644_p3 = scmp.ne.s32.totalorder %s32_s25, %s643_s10  ;;  %p649_p5 = scmp.lt.s32.totalorder %s643_s10, %s643_s10 }
   0xd   :  { %p650_p6 = por %p649_p5, %p648_p4 }
   0xf   :  { %p651_p7 = pnand %p650_p6, %p644_p3 }
  0x11   :  { %654 = shalt.err (!%p651_p7)
}
  0x12   :  { %s752_s11 = smov 128   ;;  %s753_s12 = smov 8  }
  0x13   :  { %37 = dma.hbm_to_vmem [thread:$0]  %s910_s1, 2048, %s32_s25, [#allocation6], %s752_s11, %s752_s11, %s753_s12  }
  0x14   :  { %s754_s15 = smov [#allocation2]   ;;  %s755_s17 = smov [#allocation7]  }
  0x15   :  { %s22_s16 = sshll.u32 %s754_s15, 4  ;;  %s45_s18 = sshll.u32 %s755_s17, 4  ;;  %s23_s16 = int_to_ptr.vmem [resolvable:$true] %s22_s16  ;;  %s46_s18 = int_to_ptr.vmem [resolvable:$true] %s45_s18 }
  0x16   :  { %s655_s21 = scalar_lea.hbm %s909_s0, 128 }
  0x17   :  { %p656_p8 = scmp.ne.s32.totalorder %s909_s0, %s655_s21  ;;  %p659_p9 = scmp.lt.u32.totalorder %s655_s21, %s909_s0 }
  0x19   :  { %p661_p10 = pnand %p659_p9, %p656_p8 }
  0x1b   :  { %664 = shalt.err (!%p661_p10)
}
  0x1c   :  { %s665_s1 = scalar_lea.vmem %s23_s16, 128  ;;  %p670_p12 = scmp.lt.s32.totalorder %s23_s16, %s23_s16 }
  0x1d   :  { %p666_p11 = scmp.ne.s32.totalorder %s23_s16, %s665_s1  ;;  %p671_p13 = scmp.lt.s32.totalorder %s665_s1, %s665_s1 }
  0x1f   :  { %p672_p0 = por %p671_p13, %p670_p12 }
  0x21   :  { %p673_p1 = pnand %p672_p0, %p666_p11 }
  0x23   :  { %676 = shalt.err (!%p673_p1)
}
  0x24   :  { %25 = dma.hbm_to_vmem [thread:$0]  %s909_s0, 128, %s23_s16, [#allocation3]  }
  0x25   :  { %s677_s30 = scalar_lea.hbm %s912_s3, 2048 }
  0x26   :  { %p678_p2 = scmp.ne.s32.totalorder %s912_s3, %s677_s30  ;;  %p681_p3 = scmp.lt.u32.totalorder %s677_s30, %s912_s3 }
  0x28   :  { %p683_p4 = pnand %p681_p3, %p678_p2 }
  0x2a   :  { %686 = shalt.err (!%p683_p4)
}
  0x2b   :  { %s687_s14 = scalar_lea.vmem %s46_s18, 2048  ;;  %p692_p6 = scmp.lt.s32.totalorder %s46_s18, %s46_s18 }
  0x2c   :  { %p688_p5 = scmp.ne.s32.totalorder %s46_s18, %s687_s14  ;;  %p693_p7 = scmp.lt.s32.totalorder %s687_s14, %s687_s14 }
  0x2e   :  { %p694_p8 = por %p693_p7, %p692_p6 }
  0x30   :  { %p695_p9 = pnand %p694_p8, %p688_p5 }
  0x32   :  { %698 = shalt.err (!%p695_p9)
}
  0x33   :  { %51 = dma.hbm_to_vmem [thread:$0]  %s912_s3, 2048, %s46_s18, [#allocation6], %s752_s11, %s752_s11, %s753_s12  }
  0x34   :  { %s756_s16 = smov [#allocation8]   ;;  %s699_s21 = scalar_lea.hbm %s914_s5, 2048 }
  0x35   :  { %s59_s17 = sshll.u32 %s756_s16, 4  ;;  %p700_p10 = scmp.ne.s32.totalorder %s914_s5, %s699_s21  ;;  %s60_s17 = int_to_ptr.vmem [resolvable:$true] %s59_s17 }
  0x36   :  { %p703_p11 = scmp.lt.u32.totalorder %s699_s21, %s914_s5 }
  0x38   :  { %p705_p12 = pnand %p703_p11, %p700_p10 }
  0x3a   :  { %708 = shalt.err (!%p705_p12)
}
  0x3b   :  { %s709_s1 = scalar_lea.vmem %s60_s17, 2048  ;;  %p714_p0 = scmp.lt.s32.totalorder %s60_s17, %s60_s17 }
  0x3c   :  { %p710_p13 = scmp.ne.s32.totalorder %s60_s17, %s709_s1  ;;  %p715_p1 = scmp.lt.s32.totalorder %s709_s1, %s709_s1 }
  0x3e   :  { %p716_p2 = por %p715_p1, %p714_p0 }
  0x40   :  { %p717_p3 = pnand %p716_p2, %p710_p13 }
  0x42   :  { %720 = shalt.err (!%p717_p3)
}
  0x43   :  { %65 = dma.hbm_to_vmem [thread:$0]  %s914_s5, 2048, %s60_s17, [#allocation9], %s752_s11, %s752_s11, %s753_s12  }
  0x44   :  { %743 = dma.done.wait [#allocation3], 128  }
  0x45   :  { %744 = vsyncadd [#allocation3], 4294967168 }
  0x46   :  { %745 = dma.done.wait [#allocation6], 4096  }
  0x47   :  { %746 = vsyncadd [#allocation6], 4294963200 }
  0x48   :  { %747 = dma.done.wait [#allocation9], 2048  }
  0x49   :  { %748 = vsyncadd [#allocation9], 4294965248  ;;  %v757_v0 = vmov 0.0|0.0   ;;  %vm758_vm0 = vmmov 0   ;;  %v759_v1 = vmov 0.0   ;;  %v81_v2 = vld [vmem:[#allocation5] sm:$0xff] }
  0x4a   :  { %547 = vmatprep.subr.bf16.mxu0 %v757_v0  ;;  %474 = vmatprep.mubr.msk.f32.mxu0 %vm758_vm0, %v759_v1  ;;  %v82_v3 = vld [vmem:[#allocation5 + $0x8] sm:$0xff]  ;;  %v83_v4 = vld [vmem:[#allocation5 + $0x10] sm:$0xff]  ;;  %v84_v6 = vld [vmem:[#allocation5 + $0x18] sm:$0xff] }
  0x4b   :  { %571 = vmatprep.subr.bf16.mxu1 %v757_v0  ;;  %509 = vmatprep.mubr.msk.f32.mxu1 %vm758_vm0, %v759_v1  ;;  %v548_v5 = vpack.c.bf16 %v82_v3, %v81_v2  ;;  %v551_v7 = vpack.c.bf16 %v84_v6, %v83_v4  ;;  %v85_v8 = vld [vmem:[#allocation5 + $0x20] sm:$0xff]  ;;  %v86_v9 = vld [vmem:[#allocation5 + $0x28] sm:$0xff]  ;;  %v177_v12 = vld [vmem:[#allocation7 + $0x10] sm:$0xff] }
  0x4c   :  { %v175_v10 = vld [vmem:[#allocation7] sm:$0xff]  ;;  %v176_v11 = vld [vmem:[#allocation7 + $0x8] sm:$0xff]  ;;  %v178_v13 = vld [vmem:[#allocation7 + $0x18] sm:$0xff]  ;;  %v554_v14 = vpack.c.bf16 %v86_v9, %v85_v8 }
  0x4d   :  { %549 = vmatpush3.bf16.msra.mxu0 %v548_v5  ;;  %v572_v15 = vpack.c.bf16 %v176_v11, %v175_v10  ;;  %v87_v16 = vld [vmem:[#allocation5 + $0x30] sm:$0xff]  ;;  %v88_v17 = vld [vmem:[#allocation5 + $0x38] sm:$0xff]  ;;  %v575_v18 = vpack.c.bf16 %v178_v13, %v177_v12  ;;  %v179_v19 = vld [vmem:[#allocation7 + $0x20] sm:$0xff] }
  0x4e   :  { %550 = vmatprep.subr.bf16.mxu0 %v757_v0  ;;  %v180_v20 = vld [vmem:[#allocation7 + $0x28] sm:$0xff]  ;;  %v557_v21 = vpack.c.bf16 %v88_v17, %v87_v16  ;;  %v89_v22 = vld [vmem:[#allocation5 + $0x40] sm:$0xff]  ;;  %v181_v25 = vld [vmem:[#allocation7 + $0x30] sm:$0xff] }
  0x4f   :  { %573 = vmatpush3.bf16.msra.mxu1 %v572_v15  ;;  %v90_v23 = vld [vmem:[#allocation5 + $0x48] sm:$0xff]  ;;  %v578_v24 = vpack.c.bf16 %v180_v20, %v179_v19  ;;  %v182_v26 = vld [vmem:[#allocation7 + $0x38] sm:$0xff]  ;;  %v91_v28 = vld [vmem:[#allocation5 + $0x50] sm:$0xff] }
  0x50   :  { %574 = vmatprep.subr.bf16.mxu1 %v757_v0  ;;  %v560_v27 = vpack.c.bf16 %v90_v23, %v89_v22  ;;  %v92_v29 = vld [vmem:[#allocation5 + $0x58] sm:$0xff]  ;;  %v581_v30 = vpack.c.bf16 %v182_v26, %v181_v25  ;;  %v183_v31 = vld [vmem:[#allocation7 + $0x40] sm:$0xff]  ;;  %v184_v32 = vld [vmem:[#allocation7 + $0x48] sm:$0xff] }
  0x51   :  { %552 = vmatpush3.bf16.msra.mxu0 %v551_v7  ;;  %v563_v33 = vpack.c.bf16 %v92_v29, %v91_v28  ;;  %v93_v34 = vld [vmem:[#allocation5 + $0x60] sm:$0xff]  ;;  %v94_v35 = vld [vmem:[#allocation5 + $0x68] sm:$0xff]  ;;  %v584_v36 = vpack.c.bf16 %v184_v32, %v183_v31  ;;  %v185_v37 = vld [vmem:[#allocation7 + $0x50] sm:$0xff] }
  0x52   :  { %553 = vmatprep.subr.bf16.mxu0 %v757_v0  ;;  %v186_v38 = vld [vmem:[#allocation7 + $0x58] sm:$0xff]  ;;  %v566_v39 = vpack.c.bf16 %v94_v35, %v93_v34  ;;  %v95_v40 = vld [vmem:[#allocation5 + $0x70] sm:$0xff]  ;;  %v187_v43 = vld [vmem:[#allocation7 + $0x60] sm:$0xff] }
  0x53   :  { %576 = vmatpush3.bf16.msra.mxu1 %v575_v18  ;;  %v96_v41 = vld [vmem:[#allocation5 + $0x78] sm:$0xff]  ;;  %v587_v42 = vpack.c.bf16 %v186_v38, %v185_v37  ;;  %v188_v44 = vld [vmem:[#allocation7 + $0x68] sm:$0xff]  ;;  %v189_v48 = vld [vmem:[#allocation7 + $0x70] sm:$0xff] }
  0x54   :  { %577 = vmatprep.subr.bf16.mxu1 %v757_v0  ;;  %v569_v45 = vpack.c.bf16 %v96_v41, %v95_v40  ;;  %v590_v46 = vpack.c.bf16 %v188_v44, %v187_v43  ;;  %v80_v47 = vld [vmem:[#allocation2] sm:$0xff]  ;;  %v275_v51 = vld [vmem:[#allocation8] sm:$0xff]  ;;  %v276_v52 = vld [vmem:[#allocation8 + $0x8] sm:$0xff] }
  0x55   :  { %555 = vmatpush3.bf16.msra.mxu0 %v554_v14  ;;  %v190_v49 = vld [vmem:[#allocation7 + $0x78] sm:$0xff]  ;;  %v277_v53 = vld [vmem:[#allocation8 + $0x10] sm:$0xff]  ;;  %v596_v54 = vpack.c.bf16 %v276_v52, %v275_v51  ;;  %v279_v62 = vld [vmem:[#allocation8 + $0x20] sm:$0xff] }
  0x56   :  { %556 = vmatprep.subr.bf16.mxu0 %v757_v0  ;;  %v593_v50 = vpack.c.bf16 %v190_v49, %v189_v48  ;;  %v278_v55 = vld [vmem:[#allocation8 + $0x18] sm:$0xff]  ;;  %v280_v63 = vld [vmem:[#allocation8 + $0x28] sm:$0xff]  ;;  %v281_v2 = vld [vmem:[#allocation8 + $0x30] sm:$0xff] }
  0x57   :  { %579 = vmatpush3.bf16.msra.mxu1 %v578_v24  ;;  %v599_v56 = vpack.c.bf16 %v278_v55, %v277_v53  ;;  %v387_v57 = vld [vmem:[%s911_s2] ss:$0 sm:$0xff]  ;;  %v283_v5 = vld [vmem:[#allocation8 + $0x40] sm:$0xff]  ;;  %v284_v6 = vld [vmem:[#allocation8 + $0x48] sm:$0xff] }
  0x58   :  { %580 = vmatprep.subr.bf16.mxu1 %v757_v0  ;;  %v282_v3 = vld [vmem:[#allocation8 + $0x38] sm:$0xff]  ;;  %v608_v7 = vpack.c.bf16 %v284_v6, %v283_v5  ;;  %v285_v8 = vld [vmem:[#allocation8 + $0x50] sm:$0xff]  ;;  %v287_v11 = vld [vmem:[#allocation8 + $0x60] sm:$0xff] }
  0x59   :  { %558 = vmatpush3.bf16.msra.mxu0 %v557_v21  ;;  %v605_v4 = vpack.c.bf16 %v282_v3, %v281_v2  ;;  %v286_v9 = vld [vmem:[#allocation8 + $0x58] sm:$0xff]  ;;  %v288_v12 = vld [vmem:[#allocation8 + $0x68] sm:$0xff]  ;;  %v289_v14 = vld [vmem:[#allocation8 + $0x70] sm:$0xff] }
  0x5a   :  { %559 = vmatprep.subr.bf16.mxu0 %v757_v0  ;;  %v611_v10 = vpack.c.bf16 %v286_v9, %v285_v8  ;;  %v614_v13 = vpack.c.bf16 %v288_v12, %v287_v11  ;;  %v290_v15 = vld [vmem:[#allocation8 + $0x78] sm:$0xff] }
  0x5b   :  { %582 = vmatpush3.bf16.msra.mxu1 %v581_v30  ;;  %v617_v16 = vpack.c.bf16 %v290_v15, %v289_v14  ;;  %v388_v17 = vld [vmem:[%s913_s4] ss:$0 sm:$0xff]  ;;  %s760_s4 = smov [#allocation10]  }
  0x5c   :  { %583 = vmatprep.subr.bf16.mxu1 %v757_v0  ;;  %s376_s28 = sshll.u32 %s760_s4, 4  ;;  %s377_s28 = int_to_ptr.vmem [resolvable:$true] %s376_s28 }
  0x5d   :  { %561 = vmatpush3.bf16.msra.mxu0 %v560_v27  ;;  %s721_s29 = scalar_lea.vmem %s377_s28, 128  ;;  %p726_p5 = scmp.lt.s32.totalorder %s377_s28, %s377_s28 }
  0x5e   :  { %562 = vmatprep.subr.bf16.mxu0 %v757_v0  ;;  %p722_p4 = scmp.ne.s32.totalorder %s377_s28, %s721_s29  ;;  %p727_p6 = scmp.lt.s32.totalorder %s721_s29, %s721_s29 }
  0x5f   :  { %585 = vmatpush3.bf16.msra.mxu1 %v584_v36 }
  0x60   :  { %586 = vmatprep.subr.bf16.mxu1 %v757_v0  ;;  %p728_p7 = por %p727_p6, %p726_p5 }
  0x61   :  { %564 = vmatpush3.bf16.msra.mxu0 %v563_v33 }
  0x62   :  { %565 = vmatprep.subr.bf16.mxu0 %v757_v0  ;;  %p729_p8 = pnand %p728_p7, %p722_p4 }
  0x63   :  { %588 = vmatpush3.bf16.msra.mxu1 %v587_v42 }
  0x64   :  { %589 = vmatprep.subr.bf16.mxu1 %v757_v0 }
  0x65   :  { %567 = vmatpush3.bf16.msra.mxu0 %v566_v39 }
  0x66   :  { %568 = vmatprep.subr.bf16.mxu0 %v757_v0 }
  0x67   :  { %591 = vmatpush3.bf16.msra.mxu1 %v590_v46 }
  0x68   :  { %592 = vmatprep.subr.bf16.mxu1 %v757_v0 }
  0x69   :  { %570 = vmatpush3.bf16.msra.mxu0 %v569_v45 }
  0x6a   :  { %595 = vmatprep.subr.bf16.mxu0 %v757_v0 }
  0x6b   :  { %594 = vmatpush3.bf16.msra.mxu1 %v593_v50 }
  0x6c   :  { %475 = vmatmul.mubr.f32.vlgmr.msra.gmra.mrb[0].mxu0 %v80_v47 }
  0x6d   :  { %544 = vmatprep.mubr.msk.f32.mxu0 %vm758_vm0, %v759_v1  ;;  %597 = vmatpush3.bf16.msra.mxu0 %v596_v54  ;;  %v602_v1 = vpack.c.bf16 %v280_v63, %v279_v62 }
  0x6e   :  { %598 = vmatprep.subr.bf16.mxu0 %v757_v0 }
  0x71   :  { %600 = vmatpush3.bf16.msra.mxu0 %v599_v56 }
  0x72   :  { %601 = vmatprep.subr.bf16.mxu0 %v757_v0 }
  0x75   :  { %603 = vmatpush3.bf16.msra.mxu0 %v602_v1 }
  0x76   :  { %604 = vmatprep.subr.bf16.mxu0 %v757_v0 }
  0x79   :  { %606 = vmatpush3.bf16.msra.mxu0 %v605_v4 }
  0x7a   :  { %607 = vmatprep.subr.bf16.mxu0 %v757_v0 }
  0x7d   :  { %609 = vmatpush3.bf16.msra.mxu0 %v608_v7 }
  0x7e   :  { %610 = vmatprep.subr.bf16.mxu0 %v757_v0 }
  0x81   :  { %612 = vmatpush3.bf16.msra.mxu0 %v611_v10 }
  0x82   :  { %613 = vmatprep.subr.bf16.mxu0 %v757_v0 }
  0x85   :  { %615 = vmatpush3.bf16.msra.mxu0 %v614_v13 }
  0x86   :  { %616 = vmatprep.subr.bf16.mxu0 %v757_v0  ;;  %v390_v0 = vld [vmem:[%s915_s6] ss:$0 sm:$0xff] }
  0x89   :  { %618 = vmatpush3.bf16.msra.mxu0 %v617_v16 }
 0x13f   :  { %v170_v58 = vpop.f32.mrb[0].mxu0 }
 0x140   :  { %v171_v59 = vadd.f32 %v387_v57, %v170_v58  ;;  %v476_v60 = vpop.f32.mrb[1].mxu0 }
 0x142   :  { %v174_v61 = vmax.f32 %v171_v59, 0.0 }
 0x144   :  { %510 = vmatmul.mubr.f32.vlgmr.msra.gmra.mrb[0].mxu1 %v174_v61 }
 0x217   :  { %v264_v18 = vpop.f32.mrb[0].mxu1 }
 0x218   :  { %v265_v19 = vadd.f32 %v388_v17, %v264_v18  ;;  %v511_v20 = vpop.f32.mrb[1].mxu1 }
 0x21a   :  { %v269_v21 = vmul.f32 1.442695, %v265_v19  ;;  %vm268_vm1 = vcmp.gt.f32.partialorder %v265_v19, 0.0 }
 0x21c   :  { %629 = vpow2.f32 %v269_v21 }
 0x226   :  { %v630_v22 = vpop.eup %629 }
 0x227   :  { %v389_v23 = vadd.f32 -1.0, %v630_v22 }
 0x229   :  { %v272_v24 = vmul.f32 1.6732632, %v389_v23 }
 0x22b   :  { %v273_v25 = vsel %vm268_vm1, %v265_v19, %v272_v24 }
 0x22c   :  { %v274_v26 = vmul.f32 1.050701, %v273_v25 }
 0x22e   :  { %545 = vmatmul.mubr.f32.vlgmr.msra.gmra.mrb[2].mxu0 %v274_v26 }
 0x301   :  { %v364_v27 = vpop.f32.mrb[2].mxu0 }
 0x302   :  { %v365_v28 = vadd.f32 %v390_v0, %v364_v27  ;;  %v546_v29 = vpop.f32.mrb[3].mxu0 }
 0x304   :  { %631 = vtanh.f32 %v365_v28 }
 0x30e   :  { %v632_v30 = vpop.eup %631 }
 0x30f   :  { %369 = vst [vmem:[#allocation10] sm:$0xff] %v632_v30 }
 0x310   :  { %732 = shalt.err (!%p729_p8)
}
 0x311   :  { %s733_s6 = scalar_lea.hbm %s916_s7, 128 }
 0x312   :  { %p734_p9 = scmp.ne.s32.totalorder %s916_s7, %s733_s6  ;;  %p737_p10 = scmp.lt.u32.totalorder %s733_s6, %s916_s7 }
 0x314   :  { %p739_p11 = pnand %p737_p10, %p734_p9 }
 0x316   :  { %742 = shalt.err (!%p739_p11)
}
 0x317   :  { %379 = dma.vmem_to_hbm [thread:$0]  %s377_s28, 128, %s916_s7, [#allocation4]  }
 0x318   :  { %749 = dma.done.wait [#allocation4], 128  }
 0x319   :  { %750 = vsyncadd [#allocation4], 4294967168 }
 0x31a   :  { %383 = vsyncpa [#allocation3], 1 }
 0x31b   :  { %384 = vsyncpa [#allocation6], 1 }
 0x31c   :  { %385 = vsyncpa [#allocation9], 1 }
 0x31d   :  { %386 = vsyncpa [#allocation4], 1 }

</bundles_post_ra>
